<compile_context>
chip_gen: v5e
topology: v5e:2x2
jax: 0.10.0
libtpu: 0.0.40
codegen_flags: <defaults>
</compile_context>

<pallas_src>
import functools
import math

import jax
import jax.numpy as jnp
from jax.experimental import pallas as pl
from jax.experimental.pallas import tpu as pltpu


def _round_up(x, m):
    return (x + m - 1) // m * m


def _cdiv(a, b):
    return (a + b - 1) // b


def _vmem_capacity_bytes():
    try:
        return int(pltpu.get_tpu_info().vmem_capacity_bytes)
    except Exception:
        return 64 << 20  # conservative default (v7x per-core VMEM)


def _pick_tiles(m, in_p, out_pad, x_item, w_item, o_item, budget, align_m):
    """Choose (tm, tn): a lane-dense N tile bounding the weight slab, then the largest row
    tile whose double-buffered x/out footprint fits the remaining VMEM budget."""
    # N tile: keep the (possibly double-buffered) weight block <= ~1/3 of the budget.
    tn = out_pad
    if 2 * in_p * tn * w_item > budget // 3:
        tn = 128
        for cand in range(out_pad - 128, 127, -128):   # largest multiple-of-128 divisor that fits
            if out_pad % cand == 0 and 2 * in_p * cand * w_item <= budget // 3:
                tn = cand
                break
    # M tile: spend the rest on double-buffered x / out tiles.
    rest = max(budget - 2 * in_p * tn * w_item - 8 * tn, 0)
    per_row = 2 * (in_p * x_item + tn * o_item)
    tm = min(1024, max(align_m, rest // per_row))
    if tm >= 512:
        tm = (tm // 256) * 256                          # full MXU M-passes on v6e/v7x
    tm = max(align_m, (tm // align_m) * align_m)
    tm = min(tm, _round_up(m, align_m))
    # Megacore (v7x has 2 TensorCores): keep >= 2 total grid steps when there is work to split.
    if (out_pad // tn) * _cdiv(m, tm) < 2:
        half = _round_up(_cdiv(m, 2), align_m)
        if align_m <= half < _round_up(m, align_m):
            tm = half
    return tm, tn


def _fcnet_kernel(x_ref, w_ref, b_ref, o_ref, *, activate):
    # x_ref: (TM, in_p)  w_ref: (in_p, TN)  b_ref: (1, TN)  o_ref: (TM, TN)
    xv = x_ref[...]
    if xv.dtype != w_ref.dtype:
        xv = xv.astype(w_ref.dtype)                     # bf16 MXU operands; f32 accumulation below
    y = jnp.dot(xv, w_ref[...], preferred_element_type=jnp.float32)
    y = y + b_ref[...]
    if activate == "relu":
        y = jnp.maximum(y, 0.0)
    elif activate == "sigmoid":
        y = jax.nn.sigmoid(y)
    elif activate == "tanh":
        y = jnp.tanh(y)
    o_ref[...] = y.astype(o_ref.dtype)


def prepare_fcnet_params(v, g, b, *, compute_dtype=jnp.bfloat16):
    """Precompute kernel-ready tensors once per parameter set.

    v : (out_size, in_size)  weight-norm direction tensor (PyTorch nn.Linear layout)
    g : scalar weight-norm magnitude
    b : (out_size,) bias, or None

    weight_norm(dim=None) => W_eff = g * V / ||V||_F.  The scalar scale is folded into the
    transposed weight here, in float32, before the compute-dtype cast.
    """
    out_size, in_size = v.shape
    out_pad = _round_up(max(out_size, 128), 128)        # lane-dense output columns
    # Pad K to 128 only when it pays off (K >= 128 and misaligned); tiny K stays as-is.
    in_pad = _round_up(in_size, 128) if (in_size >= 128 and in_size % 128) else in_size

    v32 = jnp.asarray(v, jnp.float32)
    scale = jnp.asarray(g, jnp.float32) / jnp.sqrt(jnp.sum(v32 * v32))
    w = jnp.transpose(v32) * scale                      # (in, out): scale folded in f32
    w = jnp.pad(w, ((0, in_pad - in_size), (0, out_pad - out_size)))
    w = w.astype(compute_dtype)

    if b is None:
        b2 = jnp.zeros((1, out_pad), jnp.float32)
    else:
        b2 = jnp.pad(jnp.asarray(b, jnp.float32).reshape(1, out_size),
                     ((0, 0), (0, out_pad - out_size)))
    return w, b2, out_size


def fcnet_forward(x, params, *, activate=None, drop=0.0, training=False, out_dtype=None):
    """FCNet forward pass.  x: (..., in_size); params from prepare_fcnet_params."""
    if training and drop > 0.0:
        # TODO(synk): training-mode dropout (Bernoulli mask via pltpu.prng_seed/prng_random_bits).
        raise NotImplementedError("training-mode dropout is not implemented")
    # Eval-mode dropout is identity (matches nn.Dropout in eval / drop == 0.0).

    w_t, b2, out_size = params
    in_p, out_pad = w_t.shape
    lead = x.shape[:-1]
    in_size = x.shape[-1]
    m = math.prod(lead) if lead else 1
    out_dtype = jnp.dtype(out_dtype or x.dtype)

    x2 = x.reshape(m, in_size)
    if in_p != in_size:                                 # K was padded at prepare time
        x2 = jnp.pad(x2, ((0, 0), (0, in_p - in_size)))

    x_item = jnp.dtype(x2.dtype).itemsize
    w_item = jnp.dtype(w_t.dtype).itemsize
    o_item = out_dtype.itemsize
    align_m = 16 if w_item < 4 else 8                   # sublane packing of the compute dtype

    cap = _vmem_capacity_bytes()
    budget = min(int(cap * 0.35), 48 << 20)             # ~22 MiB on v7x, ~45 MiB on v5e/v6e
    tm, tn = _pick_tiles(m, in_p, out_pad, x_item, w_item, o_item, budget, align_m)
    grid_n, grid_m = out_pad // tn, _cdiv(m, tm)

    footprint = (2 * in_p * tn * w_item + 2 * tn * 4
                 + 2 * tm * (in_p * x_item + tn * o_item))
    vmem_limit = int(min(int(cap * 0.9),
                         max(min(int(cap * 0.6), 96 << 20), footprint + (4 << 20))))

    activate = activate.lower() if activate is not None else None
    kernel = functools.partial(_fcnet_kernel, activate=activate)

    cost = pl.CostEstimate(
        flops=2 * m * in_p * out_pad,
        transcendentals=(m * out_pad) if activate in ("sigmoid", "tanh") else 0,
        bytes_accessed=(m * in_p * x_item + in_p * out_pad * w_item
                        + out_pad * 4 + m * out_pad * o_item),
    )

    def run(single_buffer_consts):
        # When the weight/bias blocks never change across the grid (grid_n == 1) a single VMEM
        # buffer suffices; this frees VMEM that _pick_tiles spends on bigger row tiles.
        const_kw = {"pipeline_mode": pl.Buffered(1)} if single_buffer_consts else {}
        return pl.pallas_call(
            kernel,
            out_shape=jax.ShapeDtypeStruct((m, out_pad), out_dtype),
            grid=(grid_n, grid_m),                       # N outer, M inner: x/out streamed
            in_specs=[
                pl.BlockSpec((tm, in_p), lambda j, i: (i, 0)),               # x row tile
                pl.BlockSpec((in_p, tn), lambda j, i: (0, j), **const_kw),   # weight slab
                pl.BlockSpec((1, tn), lambda j, i: (0, j), **const_kw),      # bias
            ],
            out_specs=pl.BlockSpec((tm, tn), lambda j, i: (i, j)),
            compiler_params=pltpu.CompilerParams(
                dimension_semantics=("parallel", "parallel"),  # megacore sharding on v7x
                vmem_limit_bytes=vmem_limit,
            ),
            cost_estimate=cost,
        )(x2, w_t, b2)

    use_single = grid_n == 1
    try:
        out = run(use_single)
    except Exception:
        if not use_single:
            raise
        out = run(False)                                 # pipeline_mode unsupported -> default buffering

    return out[:, :out_size].reshape(*lead, out_size)


def fcnet_reference(x, v, g, b, activate):
    w_eff = g * v / jnp.sqrt(jnp.sum(v.astype(jnp.float32) ** 2))
    y = jnp.einsum("...i,oi->...o", x, w_eff)
    if b is not None:
        y = y + b
    if activate == "relu":
        y = jnp.maximum(y, 0.0)
    elif activate == "sigmoid":
        y = jax.nn.sigmoid(y)
    elif activate == "tanh":
        y = jnp.tanh(y)
    return y


if __name__ == "__main__":
    key = jax.random.PRNGKey(0)
    batch, seq, in_size, out_size = 2, 8, 32, 64

    kx, kv, kb = jax.random.split(key, 3)
    x = jax.random.normal(kx, (batch, seq, in_size), dtype=jnp.float32)
    v = jax.random.normal(kv, (out_size, in_size), dtype=jnp.float32) * 0.1
    # PyTorch weight_norm initializes g to ||v|| (dim=None -> scalar); deterministic here.
    g = jnp.sqrt(jnp.sum(v ** 2))
    b = jax.random.normal(kb, (out_size,), dtype=jnp.float32) * 0.01

    # Precompute kernel-ready params once (hoisted transpose / norm / scale-fold / padding).
    params_bf16 = prepare_fcnet_params(v, g, b)                          # default bf16 MXU path
    params_f32 = prepare_fcnet_params(v, g, b, compute_dtype=jnp.float32)  # exact path

    for activate in (None, "relu", "tanh", "sigmoid"):
        ref = fcnet_reference(x, v, g, b, activate)

        out32 = jax.block_until_ready(fcnet_forward(x, params_f32, activate=activate, drop=0.0))
        assert out32.shape == (batch, seq, out_size)
        assert bool(jnp.allclose(out32, ref, atol=1e-5, rtol=1e-5)), f"f32 mismatch ({activate})"

        out16 = jax.block_until_ready(fcnet_forward(x, params_bf16, activate=activate, drop=0.0))
        assert out16.shape == (batch, seq, out_size)
        assert bool(jnp.allclose(out16, ref, atol=2e-2, rtol=2e-2)), f"bf16 mismatch ({activate})"

    print("KERNEL_OK")
</pallas_src>

<mosaic_0001>
module attributes {stable_mosaic.version = 11 : i64} {
  func.func @_fcnet_kernel(%arg0: i32, %arg1: i32, %arg2: memref<8x32xf32, #tpu.memory_space<vmem>>, %arg3: memref<32x128xf32, #tpu.memory_space<vmem>>, %arg4: memref<1x128xf32, #tpu.memory_space<vmem>>, %arg5: memref<8x128xf32, #tpu.memory_space<vmem>>) attributes {dimension_semantics = [#tpu.dimension_semantics<parallel>, #tpu.dimension_semantics<parallel>], iteration_bounds = array<i64: 1, 2>, scalar_prefetch = 0 : i64, scratch_operands = 0 : i64, tpu.core_type = #tpu.core_type<tc>, window_params = [{transform_indices = @transform_0, window_bounds = array<i64: 8, 32>}, {pipeline_mode = #tpu.pipeline_mode<synchronous>, transform_indices = @transform_1, window_bounds = array<i64: 32, 128>}, {pipeline_mode = #tpu.pipeline_mode<synchronous>, transform_indices = @transform_2, window_bounds = array<i64: 1, 128>}, {transform_indices = @transform_3, window_bounds = array<i64: 8, 128>}]} {
    %c0 = arith.constant 0 : index
    %c0_0 = arith.constant 0 : index
    %0 = vector.load %arg2[%c0, %c0_0] : memref<8x32xf32, #tpu.memory_space<vmem>>, vector<8x32xf32>
    %c0_1 = arith.constant 0 : index
    %c0_2 = arith.constant 0 : index
    %1 = vector.load %arg3[%c0_1, %c0_2] : memref<32x128xf32, #tpu.memory_space<vmem>>, vector<32x128xf32>
    %cst = arith.constant dense<0.000000e+00> : vector<8x128xf32>
    %2 = tpu.matmul %0, %1, %cst {dimension_numbers = #tpu.dot_dimension_numbers<[1], [0], [0], [1], [0, 0, 1, 1], [], []>} : vector<8x32xf32>, vector<32x128xf32>, vector<8x128xf32> -> vector<8x128xf32>
    %c0_3 = arith.constant 0 : index
    %c0_4 = arith.constant 0 : index
    %3 = vector.load %arg4[%c0_3, %c0_4] : memref<1x128xf32, #tpu.memory_space<vmem>>, vector<1x128xf32>
    %4 = vector.broadcast %3 : vector<1x128xf32> to vector<8x128xf32>
    %5 = arith.addf %2, %4 : vector<8x128xf32>
    %c0_5 = arith.constant 0 : index
    %c0_6 = arith.constant 0 : index
    %6 = vector.load %arg5[%c0_5, %c0_6] : memref<8x128xf32, #tpu.memory_space<vmem>>, vector<8x128xf32>
    tpu.vector_store %arg5[%c0_5, %c0_6], %5 {strides = array<i32>} : memref<8x128xf32, #tpu.memory_space<vmem>>, vector<8x128xf32>,
    return
  }
  func.func @transform_0(%arg0: i32, %arg1: i32) -> (i32, i32) {
    %c0_i32 = arith.constant 0 : i32
    %c0_i32_0 = arith.constant 0 : i32
    return %arg1, %c0_i32 : i32, i32
  }
  func.func @transform_1(%arg0: i32, %arg1: i32) -> (i32, i32) {
    %c0_i32 = arith.constant 0 : i32
    %c0_i32_0 = arith.constant 0 : i32
    return %c0_i32, %arg0 : i32, i32
  }
  func.func @transform_2(%arg0: i32, %arg1: i32) -> (i32, i32) {
    %c0_i32 = arith.constant 0 : i32
    %c0_i32_0 = arith.constant 0 : i32
    return %c0_i32, %arg0 : i32, i32
  }
  func.func @transform_3(%arg0: i32, %arg1: i32) -> (i32, i32) {
    %c0_i32 = arith.constant 0 : i32
    return %arg1, %arg0 : i32, i32
  }
}

module attributes {stable_mosaic.version = 11 : i64} {
  func.func @_fcnet_kernel(%arg0: i32, %arg1: i32, %arg2: memref<8x32xf32, #tpu.memory_space<vmem>>, %arg3: memref<32x128xf32, #tpu.memory_space<vmem>>, %arg4: memref<1x128xf32, #tpu.memory_space<vmem>>, %arg5: memref<8x128xf32, #tpu.memory_space<vmem>>) attributes {dimension_semantics = [#tpu.dimension_semantics<parallel>, #tpu.dimension_semantics<parallel>], iteration_bounds = array<i64: 1, 2>, scalar_prefetch = 0 : i64, scratch_operands = 0 : i64, tpu.core_type = #tpu.core_type<tc>, window_params = [{transform_indices = @transform_0, window_bounds = array<i64: 8, 32>}, {transform_indices = @transform_1, window_bounds = array<i64: 32, 128>}, {transform_indices = @transform_2, window_bounds = array<i64: 1, 128>}, {transform_indices = @transform_3, window_bounds = array<i64: 8, 128>}]} {
    %c0 = arith.constant 0 : index
    %c0_0 = arith.constant 0 : index
    %0 = vector.load %arg2[%c0, %c0_0] : memref<8x32xf32, #tpu.memory_space<vmem>>, vector<8x32xf32>
    %c0_1 = arith.constant 0 : index
    %c0_2 = arith.constant 0 : index
    %1 = vector.load %arg3[%c0_1, %c0_2] : memref<32x128xf32, #tpu.memory_space<vmem>>, vector<32x128xf32>
    %cst = arith.constant dense<0.000000e+00> : vector<8x128xf32>
    %2 = tpu.matmul %0, %1, %cst {dimension_numbers = #tpu.dot_dimension_numbers<[1], [0], [0], [1], [0, 0, 1, 1], [], []>} : vector<8x32xf32>, vector<32x128xf32>, vector<8x128xf32> -> vector<8x128xf32>
    %c0_3 = arith.constant 0 : index
    %c0_4 = arith.constant 0 : index
    %3 = vector.load %arg4[%c0_3, %c0_4] : memref<1x128xf32, #tpu.memory_space<vmem>>, vector<1x128xf32>
    %4 = vector.broadcast %3 : vector<1x128xf32> to vector<8x128xf32>
    %5 = arith.addf %2, %4 : vector<8x128xf32>
    %c0_5 = arith.constant 0 : index
    %c0_6 = arith.constant 0 : index
    %6 = vector.load %arg5[%c0_5, %c0_6] : memref<8x128xf32, #tpu.memory_space<vmem>>, vector<8x128xf32>
    tpu.vector_store %arg5[%c0_5, %c0_6], %5 {strides = array<i32>} : memref<8x128xf32, #tpu.memory_space<vmem>>, vector<8x128xf32>,
    return
  }
  func.func @transform_0(%arg0: i32, %arg1: i32) -> (i32, i32) {
    %c0_i32 = arith.constant 0 : i32
    %c0_i32_0 = arith.constant 0 : i32
    return %arg1, %c0_i32 : i32, i32
  }
  func.func @transform_1(%arg0: i32, %arg1: i32) -> (i32, i32) {
    %c0_i32 = arith.constant 0 : i32
    %c0_i32_0 = arith.constant 0 : i32
    return %c0_i32, %arg0 : i32, i32
  }
  func.func @transform_2(%arg0: i32, %arg1: i32) -> (i32, i32) {
    %c0_i32 = arith.constant 0 : i32
    %c0_i32_0 = arith.constant 0 : i32
    return %c0_i32, %arg0 : i32, i32
  }
  func.func @transform_3(%arg0: i32, %arg1: i32) -> (i32, i32) {
    %c0_i32 = arith.constant 0 : i32
    return %arg1, %arg0 : i32, i32
  }
}

</mosaic_0001>

<bundles_post_ra>
// kernel: tpu_custom_call.1
= control target key start
LH: loop header
LB: loop body
LE: loop exit
PB: predicated region body
PF: predicated region fallthrough
CT: control target
= control target key end

     0   :  { %8 = vsyncpa [#allocation3], 0  ;;  %s804_s0 = inlined_call_operand.hbm [shape: f32[16,32], index: 0, kind: input, shape index: {}]   ;;  %s805_s1 = inlined_call_operand.hbm [shape: f32[32,128], index: 1, kind: input, shape index: {}]   ;;  %s806_s2 = inlined_call_operand.vmem [shape: f32[1,128], index: 2, kind: input, shape index: {}]   ;;  %s807_s3 = inlined_call_operand.hbm [shape: f32[16,128], index: 3, kind: output, shape index: {}]  }
   0x1   :  { %10 = vsyncpa [#allocation3 + $0x1], 0 }
   0x2   :  { %11 = vsyncpa [#allocation6], 0 }
   0x3   :  { %12 = vsyncpa [#allocation4], 0 }
   0x4   :  { %14 = vsyncpa [#allocation4 + $0x1], 0  ;;  %s658_s12 = smov 0   ;;  %s660_s13 = smov 0  }
   0x5   :  { %s662_s14 = smov 0   ;;  %s664_s15 = smov 0  }
   0x6   :  { %s666_s16 = smov 0   ;;  %s668_s17 = smov 0  }
   0x7 LB: > { %s394_s18 = sadd.s32 4294967295, %s633_s17   ;;  %p396_p0 = scmp.ge.s32.totalorder %s633_s17, 1  ;;  %s633_s17 = sphi %s668_s17, %s20_s17   ;;  %s629_s16 = sphi %s666_s16, %s818_s16   ;;  %s625_s15 = sphi %s664_s15, %s817_s15   ;;  %s621_s14 = sphi %s662_s14, %s816_s14   ;;  %s617_s13 = sphi %s660_s13, %s815_s13   ;;  %s613_s12 = sphi %s658_s12, %s814_s12  }
   0x8   : > { %p690_p1 = scmp.eq.s32.totalorder %s394_s18, 0  ;;  %p143_p2 = scmp.lt.s32.totalorder %s633_s17, 3 }
   0x9   : > { %s156_s22 = sshll.u32 %s805_s1, 4  ;;  %s635_s24 = smov [#allocation5]   ;;  %s157_s22 = int_to_ptr.hbm [resolvable:$true] %s156_s22 }
   0xa   : > { %p698_p3 = pnand %p396_p0, %p143_p2  ;;  %s158_s25 = sshll.u32 %s635_s24, 4  ;;  %s159_s25 = int_to_ptr.vmem [resolvable:$true] %s158_s25 }
   0xb   : > { %p399_p6 = scmp.ge.s32.totalorder %s633_s17, 2  ;;  %s636_s26 = smov 128  }
   0xc   : > { %p419_p4 = pneg %p698_p3  ;;  %s637_s27 = smov 8  }
   0xd   : > { %s395_s28 = sadd.s32 4294967294, %s633_s17   ;;  %s29_s29 = sadd.s32 1, %s629_s16 }
   0xe   : > { %p420_p5 = pnand %p419_p4, %p690_p1  ;;  %s39_s30 = sadd.s32 1, %s621_s14 }
   0xf   : > { %p30_p7 = scmp.ge.s32.totalorder %s29_s29, 2  ;;  %p46_p8 = scmp.ne.s32.totalorder %s621_s14, %s617_s13 }
  0x10   : > { %422 = dma.hbm_to_vmem [thread:$0]  (!%p420_p5), %s157_s22, 512, %s159_s25, [#allocation6], %s636_s26, %s636_s26, %s637_s27  }
  0x11   : > { %p47_p9 = scmp.eq.s32.totalorder %s633_s17, 0  ;;  %p52_p10 = scmp.ne.s32.totalorder %s617_s13, %s613_s12 }
  0x12   : > { %s820_s29 = smov (%p30_p7, %s29_s29), 0  ;;  %p130_p13 = scmp.eq.s32.totalorder %s394_s18, 1 }
  0x13   : > { %p717_p11 = por %p47_p9, %p46_p8  ;;  %p723_p12 = por %p690_p1, %p52_p10 }
  0x14   : > { %s36_s6 = ssub.s32 %s629_s16, %s820_s29  ;;  %p136_p2 = scmp.eq.s32.totalorder %s395_s28, 1 }
  0x15   : > { %p37_p0 = scmp.eq.s32.totalorder %s36_s6, 0  ;;  %p729_p4 = por %p130_p13, %p46_p8 }
  0x16   : > { %p432_p5 = scmp.lt.s32.totalorder %s633_s17, 2  ;;  %p737_p7 = por %p136_p2, %p52_p10 }
  0x17   : > { %s735_s8 = scalar_select %p37_p0, %s621_s14, %s39_s30  }
  0x18   : > { %s178_s10 = sand.u32 1, %s621_s14   ;;  %s401_s20 = sshll.u32 %s629_s16, 3 }
  0x19   : > { %s400_s11 = sshll.u32 %s178_s10, 3  ;;  %s186_s18 = scalar_lea.hbm %s804_s0, %s401_s20 }
  0x1a   : > { %s182_s24 = scalar_lea.vmem [#allocation2], %s400_s11  ;;  %s188_s26 = sshll.u32 %s186_s18, 4  ;;  %s189_s26 = int_to_ptr.hbm [resolvable:$true] %s188_s26 }
  0x1b   : > { %s190_s25 = sshll.u32 %s182_s24, 4  ;;  %p424_p8 = pnand %p432_p5, %p717_p11  ;;  %s191_s25 = int_to_ptr.vmem [resolvable:$true] %s190_s25 }
  0x1c   : > { %s179_s27 = scalar_lea.sflag [#allocation3], %s178_s10  ;;  %199 = sbr.rel (%p698_p3) target bundleno = 175 (0xaf), region = 32 }
  0x1d   : > { %426 = dma.hbm_to_vmem [thread:$0]  (!%p424_p8), %s189_s26, 128, %s191_s25, %s179_s27  }
  0x1e   : > { %s751_s28 = sand.u32 (!%p698_p3), 1, %s617_s13  }
  0x1f   : > { %s403_s30 = sshll.u32 (!%p698_p3), %s751_s28, 3  ;;  %s202_s6 = scalar_lea.sflag (!%p698_p3), [#allocation3], %s751_s28 }
  0x20   : > { %s205_s11 = scalar_lea.vmem (!%p698_p3), [#allocation2], %s403_s30 }
  0x21   : > { %600 = dma.done.wait (%p723_p12), %s202_s6, 128  }
  0x22   : > { %602 = vsyncadd (%p723_p12), %s202_s6, 4294967168 }
  0x23   : > { %604 = dma.done.wait (%p690_p1), [#allocation6], 512  }
  0x24   : > { %606 = vsyncadd (%p690_p1), [#allocation6], 4294966784  ;;  %v244_v0 = vld [vmem:[#allocation5 + $0x18] sm:$0xff]  ;;  %v243_v1 = vld [vmem:[#allocation5 + $0x10] sm:$0xff]  ;;  %vm249_vm0 = vcmask 261120   ;;  %s408_s23 = sshll.u32 %s625_s15, 3 }
  0x25   : > { %265 = vmatpush.msra.mxu0 %v244_v0  ;;  %v242_v2 = vld [vmem:[#allocation5 + $0x8] sm:$0xff]  ;;  %v241_v3 = vld [vmem:[#allocation5] sm:$0xff]  ;;  %v240_v4 = vld [vmem:[%s205_s11] sm:$0xff]  ;;  %s286_s19 = scalar_lea.hbm %s807_s3, %s408_s23  ;;  %s236_s21 = scalar_lea.vmem [#allocation7], %s403_s30 }
  0x26   : > { %v486_v5 = vld [vmem:[%s806_s2] ss:$0 sm:$0xff]  ;;  %s288_s22 = sshll.u32 %s236_s21, 4  ;;  %s290_s18 = sshll.u32 %s286_s19, 4  ;;  %s289_s22 = int_to_ptr.vmem [resolvable:$true] %s288_s22  ;;  %s291_s18 = int_to_ptr.hbm [resolvable:$true] %s290_s18 }
  0x27   : > { %266 = vmatpush.msra.mxu0 %v243_v1  ;;  %s275_s24 = scalar_lea.sflag [#allocation4], %s751_s28  ;;  %s561_s25 = sshra.s32 %s291_s18, 4  ;;  %s562_s25 = int_to_ptr.hbm [resolvable:$true] %s561_s25 }
  0x28   : > { %s563_s15 = scalar_lea.hbm %s562_s25, 8  ;;  %s567_s6 = scalar_lea.hbm %s807_s3, 16 }
  0x29   : > { %267 = vmatpush.msra.mxu0 %v242_v2  ;;  %p564_p1 = scmp.ne.s32.totalorder %s562_s25, %s563_s15  ;;  %p568_p10 = scmp.lt.s32.totalorder %s562_s25, %s807_s3 }
  0x2a   : > { %p569_p11 = scmp.lt.s32.totalorder %s567_s6, %s563_s15 }
  0x2b   : > { %268 = vmatpush.msra.mxu0 %v241_v3  ;;  %p565_p3 = pnand %p564_p1, %p729_p4 }
  0x2c   : > { %406 = vmatmul.msk.f32.vlgmr.msra.gmra.mxu0 %vm249_vm0, %v240_v4  ;;  %p570_p12 = por %p569_p11, %p568_p10 }
  0x2d   : > { %p566_p9 = pneg %p565_p3 }
  0x2f   : > { %p571_p13 = pnand %p570_p12, %p566_p9 }
  0xa9   : > { %v270_v6 = vpop.f32.mrf.mxu0 }
  0xaa   : > { %v271_v7 = vadd.f32 %v486_v5, %v270_v6 }
  0xac   : > { %273 = vst [vmem:[%s236_s21] sm:$0xff] %v271_v7 }
  0xad   : > { %574 = shalt.err (!%p571_p13)
}
  0xae   : > { %417 = dma.vmem_to_hbm [thread:$0]  (%p729_p4), %s289_s22, 128, %s291_s18, %s275_s24  }
  0xaf PF: > { %s302_s28 = sand.u32 1, %s613_s12   ;;  %p428_p0 = pnand %p399_p6, %p737_p7 }
  0xb0   : > { %s303_s23 = scalar_lea.sflag [#allocation4], %s302_s28 }
  0xb1   : > { %p429_p2 = pneg %p428_p0 }
  0xb3   : > { %608 = dma.done.wait (%p429_p2), %s303_s23, 128  }
  0xb4   : > { %610 = vsyncadd (%p429_p2), %s303_s23, 4294967168  ;;  %s20_s17 = sadd.s32 1, %s633_s17   ;;  %s814_s12 = smov %s617_s13 }
  0xb5   : > { %p17_p5 = scmp.ge.s32.totalorder %s20_s17, 4   ;;  %s815_s13 = smov %s621_s14 }
  0xb6   : > { %s816_s14 = smov %s735_s8  ;;  %s817_s15 = smov %s629_s16 }
  0xb7   : > { %s818_s16 = smov %s820_s29  ;;  %19 = sbr.rel (!%p17_p5) target bundleno = 7 (0x7), region = 85 }
  0xbc   :  { %309 = vsyncpa [#allocation3], 1 }
  0xbd   :  { %311 = vsyncpa [#allocation3 + $0x1], 1 }
  0xbe   :  { %312 = vsyncpa [#allocation6], 1 }
  0xbf   :  { %313 = vsyncpa [#allocation4], 1 }
  0xc0   :  { %315 = vsyncpa [#allocation4 + $0x1], 1 }

// kernel: tpu_custom_call.1
= control target key start
LH: loop header
LB: loop body
LE: loop exit
PB: predicated region body
PF: predicated region fallthrough
CT: control target
= control target key end

     0   :  { %8 = vsyncpa [#allocation3], 0  ;;  %s804_s0 = inlined_call_operand.hbm [shape: f32[16,32], index: 0, kind: input, shape index: {}]   ;;  %s805_s1 = inlined_call_operand.hbm [shape: f32[32,128], index: 1, kind: input, shape index: {}]   ;;  %s806_s2 = inlined_call_operand.vmem [shape: f32[1,128], index: 2, kind: input, shape index: {}]   ;;  %s807_s3 = inlined_call_operand.hbm [shape: f32[16,128], index: 3, kind: output, shape index: {}]  }
   0x1   :  { %10 = vsyncpa [#allocation3 + $0x1], 0 }
   0x2   :  { %11 = vsyncpa [#allocation6], 0 }
   0x3   :  { %12 = vsyncpa [#allocation4], 0 }
   0x4   :  { %14 = vsyncpa [#allocation4 + $0x1], 0  ;;  %s658_s12 = smov 0   ;;  %s660_s13 = smov 0  }
   0x5   :  { %s662_s14 = smov 0   ;;  %s664_s15 = smov 0  }
   0x6   :  { %s666_s16 = smov 0   ;;  %s668_s17 = smov 0  }
   0x7 LB: > { %s394_s18 = sadd.s32 4294967295, %s633_s17   ;;  %p396_p0 = scmp.ge.s32.totalorder %s633_s17, 1  ;;  %s633_s17 = sphi %s668_s17, %s20_s17   ;;  %s629_s16 = sphi %s666_s16, %s818_s16   ;;  %s625_s15 = sphi %s664_s15, %s817_s15   ;;  %s621_s14 = sphi %s662_s14, %s816_s14   ;;  %s617_s13 = sphi %s660_s13, %s815_s13   ;;  %s613_s12 = sphi %s658_s12, %s814_s12  }
   0x8   : > { %p690_p1 = scmp.eq.s32.totalorder %s394_s18, 0  ;;  %p143_p2 = scmp.lt.s32.totalorder %s633_s17, 3 }
   0x9   : > { %s156_s22 = sshll.u32 %s805_s1, 4  ;;  %s635_s24 = smov [#allocation5]   ;;  %s157_s22 = int_to_ptr.hbm [resolvable:$true] %s156_s22 }
   0xa   : > { %p698_p3 = pnand %p396_p0, %p143_p2  ;;  %s158_s25 = sshll.u32 %s635_s24, 4  ;;  %s159_s25 = int_to_ptr.vmem [resolvable:$true] %s158_s25 }
   0xb   : > { %p399_p6 = scmp.ge.s32.totalorder %s633_s17, 2  ;;  %s636_s26 = smov 128  }
   0xc   : > { %p419_p4 = pneg %p698_p3  ;;  %s637_s27 = smov 8  }
   0xd   : > { %s395_s28 = sadd.s32 4294967294, %s633_s17   ;;  %s29_s29 = sadd.s32 1, %s629_s16 }
   0xe   : > { %p420_p5 = pnand %p419_p4, %p690_p1  ;;  %s39_s30 = sadd.s32 1, %s621_s14 }
   0xf   : > { %p30_p7 = scmp.ge.s32.totalorder %s29_s29, 2  ;;  %p46_p8 = scmp.ne.s32.totalorder %s621_s14, %s617_s13 }
  0x10   : > { %422 = dma.hbm_to_vmem [thread:$0]  (!%p420_p5), %s157_s22, 512, %s159_s25, [#allocation6], %s636_s26, %s636_s26, %s637_s27  }
  0x11   : > { %p47_p9 = scmp.eq.s32.totalorder %s633_s17, 0  ;;  %p52_p10 = scmp.ne.s32.totalorder %s617_s13, %s613_s12 }
  0x12   : > { %s820_s29 = smov (%p30_p7, %s29_s29), 0  ;;  %p130_p13 = scmp.eq.s32.totalorder %s394_s18, 1 }
  0x13   : > { %p717_p11 = por %p47_p9, %p46_p8  ;;  %p723_p12 = por %p690_p1, %p52_p10 }
  0x14   : > { %s36_s6 = ssub.s32 %s629_s16, %s820_s29  ;;  %p136_p2 = scmp.eq.s32.totalorder %s395_s28, 1 }
  0x15   : > { %p37_p0 = scmp.eq.s32.totalorder %s36_s6, 0  ;;  %p729_p4 = por %p130_p13, %p46_p8 }
  0x16   : > { %p432_p5 = scmp.lt.s32.totalorder %s633_s17, 2  ;;  %p737_p7 = por %p136_p2, %p52_p10 }
  0x17   : > { %s735_s8 = scalar_select %p37_p0, %s621_s14, %s39_s30  }
  0x18   : > { %s178_s10 = sand.u32 1, %s621_s14   ;;  %s401_s20 = sshll.u32 %s629_s16, 3 }
  0x19   : > { %s400_s11 = sshll.u32 %s178_s10, 3  ;;  %s186_s18 = scalar_lea.hbm %s804_s0, %s401_s20 }
  0x1a   : > { %s182_s24 = scalar_lea.vmem [#allocation2], %s400_s11  ;;  %s188_s26 = sshll.u32 %s186_s18, 4  ;;  %s189_s26 = int_to_ptr.hbm [resolvable:$true] %s188_s26 }
  0x1b   : > { %s190_s25 = sshll.u32 %s182_s24, 4  ;;  %p424_p8 = pnand %p432_p5, %p717_p11  ;;  %s191_s25 = int_to_ptr.vmem [resolvable:$true] %s190_s25 }
  0x1c   : > { %s179_s27 = scalar_lea.sflag [#allocation3], %s178_s10  ;;  %199 = sbr.rel (%p698_p3) target bundleno = 175 (0xaf), region = 32 }
  0x1d   : > { %426 = dma.hbm_to_vmem [thread:$0]  (!%p424_p8), %s189_s26, 128, %s191_s25, %s179_s27  }
  0x1e   : > { %s751_s28 = sand.u32 (!%p698_p3), 1, %s617_s13  }
  0x1f   : > { %s403_s30 = sshll.u32 (!%p698_p3), %s751_s28, 3  ;;  %s202_s6 = scalar_lea.sflag (!%p698_p3), [#allocation3], %s751_s28 }
  0x20   : > { %s205_s11 = scalar_lea.vmem (!%p698_p3), [#allocation2], %s403_s30 }
  0x21   : > { %600 = dma.done.wait (%p723_p12), %s202_s6, 128  }
  0x22   : > { %602 = vsyncadd (%p723_p12), %s202_s6, 4294967168 }
  0x23   : > { %604 = dma.done.wait (%p690_p1), [#allocation6], 512  }
  0x24   : > { %606 = vsyncadd (%p690_p1), [#allocation6], 4294966784  ;;  %v244_v0 = vld [vmem:[#allocation5 + $0x18] sm:$0xff]  ;;  %v243_v1 = vld [vmem:[#allocation5 + $0x10] sm:$0xff]  ;;  %vm249_vm0 = vcmask 261120   ;;  %s408_s23 = sshll.u32 %s625_s15, 3 }
  0x25   : > { %265 = vmatpush.msra.mxu0 %v244_v0  ;;  %v242_v2 = vld [vmem:[#allocation5 + $0x8] sm:$0xff]  ;;  %v241_v3 = vld [vmem:[#allocation5] sm:$0xff]  ;;  %v240_v4 = vld [vmem:[%s205_s11] sm:$0xff]  ;;  %s286_s19 = scalar_lea.hbm %s807_s3, %s408_s23  ;;  %s236_s21 = scalar_lea.vmem [#allocation7], %s403_s30 }
  0x26   : > { %v486_v5 = vld [vmem:[%s806_s2] ss:$0 sm:$0xff]  ;;  %s288_s22 = sshll.u32 %s236_s21, 4  ;;  %s290_s18 = sshll.u32 %s286_s19, 4  ;;  %s289_s22 = int_to_ptr.vmem [resolvable:$true] %s288_s22  ;;  %s291_s18 = int_to_ptr.hbm [resolvable:$true] %s290_s18 }
  0x27   : > { %266 = vmatpush.msra.mxu0 %v243_v1  ;;  %s275_s24 = scalar_lea.sflag [#allocation4], %s751_s28  ;;  %s561_s25 = sshra.s32 %s291_s18, 4  ;;  %s562_s25 = int_to_ptr.hbm [resolvable:$true] %s561_s25 }
  0x28   : > { %s563_s15 = scalar_lea.hbm %s562_s25, 8  ;;  %s567_s6 = scalar_lea.hbm %s807_s3, 16 }
  0x29   : > { %267 = vmatpush.msra.mxu0 %v242_v2  ;;  %p564_p1 = scmp.ne.s32.totalorder %s562_s25, %s563_s15  ;;  %p568_p10 = scmp.lt.s32.totalorder %s562_s25, %s807_s3 }
  0x2a   : > { %p569_p11 = scmp.lt.s32.totalorder %s567_s6, %s563_s15 }
  0x2b   : > { %268 = vmatpush.msra.mxu0 %v241_v3  ;;  %p565_p3 = pnand %p564_p1, %p729_p4 }
  0x2c   : > { %406 = vmatmul.msk.f32.vlgmr.msra.gmra.mxu0 %vm249_vm0, %v240_v4  ;;  %p570_p12 = por %p569_p11, %p568_p10 }
  0x2d   : > { %p566_p9 = pneg %p565_p3 }
  0x2f   : > { %p571_p13 = pnand %p570_p12, %p566_p9 }
  0xa9   : > { %v270_v6 = vpop.f32.mrf.mxu0 }
  0xaa   : > { %v271_v7 = vadd.f32 %v486_v5, %v270_v6 }
  0xac   : > { %273 = vst [vmem:[%s236_s21] sm:$0xff] %v271_v7 }
  0xad   : > { %574 = shalt.err (!%p571_p13)
}
  0xae   : > { %417 = dma.vmem_to_hbm [thread:$0]  (%p729_p4), %s289_s22, 128, %s291_s18, %s275_s24  }
  0xaf PF: > { %s302_s28 = sand.u32 1, %s613_s12   ;;  %p428_p0 = pnand %p399_p6, %p737_p7 }
  0xb0   : > { %s303_s23 = scalar_lea.sflag [#allocation4], %s302_s28 }
  0xb1   : > { %p429_p2 = pneg %p428_p0 }
  0xb3   : > { %608 = dma.done.wait (%p429_p2), %s303_s23, 128  }
  0xb4   : > { %610 = vsyncadd (%p429_p2), %s303_s23, 4294967168  ;;  %s20_s17 = sadd.s32 1, %s633_s17   ;;  %s814_s12 = smov %s617_s13 }
  0xb5   : > { %p17_p5 = scmp.ge.s32.totalorder %s20_s17, 4   ;;  %s815_s13 = smov %s621_s14 }
  0xb6   : > { %s816_s14 = smov %s735_s8  ;;  %s817_s15 = smov %s629_s16 }
  0xb7   : > { %s818_s16 = smov %s820_s29  ;;  %19 = sbr.rel (!%p17_p5) target bundleno = 7 (0x7), region = 85 }
  0xbc   :  { %309 = vsyncpa [#allocation3], 1 }
  0xbd   :  { %311 = vsyncpa [#allocation3 + $0x1], 1 }
  0xbe   :  { %312 = vsyncpa [#allocation6], 1 }
  0xbf   :  { %313 = vsyncpa [#allocation4], 1 }
  0xc0   :  { %315 = vsyncpa [#allocation4 + $0x1], 1 }

</bundles_post_ra>
